<compile_context>
chip_gen: v5e
topology: v5e:2x2
jax: 0.10.0
libtpu: 0.0.40
codegen_flags: <defaults>
</compile_context>

<pallas_src>
import math

import jax
import jax.numpy as jnp
from jax import lax
from jax.experimental import pallas as pl
from jax.experimental.pallas import tpu as pltpu

BN_EPS = 1e-5


def _gelu_tanh(x):
    c = math.sqrt(2.0 / math.pi)
    return 0.5 * x * (1.0 + jnp.tanh(c * (x + 0.044715 * (x * x * x))))


def encoder_block_kernel(patch_ref, w_ref, b_ref, gamma_ref, beta_ref,
                         out_ref, acc_ref):
    """One grid step per 2x2 pool phase p in [0, 4).

    patch_ref: (K, R)    im2col patches for this phase (K = 9*Cin, R = N*Hp*Wp)
    w_ref:     (Cout, K) conv weights, k ordered as (dy, dx, cin)
    b_ref / gamma_ref / beta_ref: (Cout, 1)
    out_ref:   (Cout, R) lane-dense, channel-major output
    acc_ref:   (Cout, R) f32 VMEM scratch (running max over pool phases)
    """
    p = pl.program_id(0)

    # Conv for this pool phase: a single MXU matmul with f32 accumulation.
    conv = jnp.dot(w_ref[...], patch_ref[...],
                   preferred_element_type=jnp.float32)        # (Cout, R)

    @pl.when(p == 0)
    def _():
        acc_ref[...] = conv

    @pl.when(p > 0)
    def _():
        acc_ref[...] = jnp.maximum(acc_ref[...], conv)        # MaxPool2d(2,2)

    @pl.when(p == pl.num_programs(0) - 1)
    def _():
        # Bias folded in after the max (constant per channel).
        pooled = acc_ref[...] + b_ref[...]                    # (Cout, R)
        inv_r = 1.0 / pooled.shape[1]
        # Single-pass, biased (training-mode) batch statistics: lane reductions.
        mean = jnp.sum(pooled, axis=1, keepdims=True) * inv_r
        ex2 = jnp.sum(pooled * pooled, axis=1, keepdims=True) * inv_r
        var = ex2 - mean * mean
        inv_std = lax.rsqrt(var + BN_EPS)
        # BN folded to one per-channel scale/shift -> single mul+add per elem.
        scale = gamma_ref[...] * inv_std                      # (Cout, 1)
        shift = beta_ref[...] - mean * scale
        y = pooled * scale + shift
        out_ref[...] = _gelu_tanh(y).astype(out_ref.dtype)


def encoder_block_forward(x_nchw, w_oihw, bias, gamma, beta):
    """EncoderBlock forward.  x_nchw: (N, Cin, H, W) float32 -> (N, Cout, H/2, W/2)."""
    N, Cin, H, W = x_nchw.shape
    Cout = w_oihw.shape[0]
    assert H % 2 == 0 and W % 2 == 0, "MaxPool2d(2,2) expects even H, W"
    Hp, Wp = H // 2, W // 2
    R = N * Hp * Wp          # pooled pixels (lane axis inside the kernel)
    K = 9 * Cin              # im2col contraction depth

    # --- wrapper-side layout plumbing (tiny tensors, fused by XLA) -----------
    # NCHW -> NHWC, zero-pad for the 3x3 'same' conv.
    x_nhwc = jnp.transpose(x_nchw, (0, 2, 3, 1)).astype(jnp.float32)
    x_pad = jnp.pad(x_nhwc, ((0, 0), (1, 1), (1, 1), (0, 0)))
    # im2col taps: (N, H, W, 9, Cin), tap index t = dy*3 + dx.
    taps = jnp.stack([x_pad[:, dy:dy + H, dx:dx + W, :]
                      for dy in range(3) for dx in range(3)], axis=3)
    # Group output pixels by 2x2 pool phase, channel/tap-major, pixel-minor:
    # (N, Hp, ph, Wp, pw, t, c) -> (ph, pw, t, c, N, Hp, Wp) -> (4, K, R)
    taps = taps.reshape(N, Hp, 2, Wp, 2, 9, Cin)
    patches = jnp.transpose(taps, (2, 4, 5, 6, 0, 1, 3)).reshape(4, K, R)

    # Conv weight (Cout, Cin, 3, 3) OIHW -> (Cout, 9*Cin) with k = (dy, dx, cin).
    w_t = jnp.transpose(w_oihw, (0, 2, 3, 1)).reshape(Cout, K).astype(jnp.float32)
    b2 = bias.reshape(Cout, 1).astype(jnp.float32)
    g2 = gamma.reshape(Cout, 1).astype(jnp.float32)
    be2 = beta.reshape(Cout, 1).astype(jnp.float32)

    out = pl.pallas_call(
        encoder_block_kernel,
        out_shape=jax.ShapeDtypeStruct((Cout, R), jnp.float32),
        grid=(4,),                                    # 2x2 pool phases (reduction)
        in_specs=[
            pl.BlockSpec((None, K, R), lambda p: (p, 0, 0)),   # per-phase patches
            pl.BlockSpec((Cout, K), lambda p: (0, 0)),
            pl.BlockSpec((Cout, 1), lambda p: (0, 0)),
            pl.BlockSpec((Cout, 1), lambda p: (0, 0)),
            pl.BlockSpec((Cout, 1), lambda p: (0, 0)),
        ],
        out_specs=pl.BlockSpec((Cout, R), lambda p: (0, 0)),
        scratch_shapes=[pltpu.VMEM((Cout, R), jnp.float32)],
        compiler_params=pltpu.CompilerParams(
            dimension_semantics=("arbitrary",)),      # pool-phase axis is a reduction
    )(patches, w_t, b2, g2, be2)

    # (Cout, N*Hp*Wp) -> (N, Cout, Hp, Wp) to match the PyTorch output layout.
    return jnp.transpose(out.reshape(Cout, N, Hp, Wp), (1, 0, 2, 3))


def _reference_forward(x_nchw, w_oihw, bias, gamma, beta):
    """Pure-JAX reference of the EncoderBlock forward (sanity check only)."""
    conv = lax.conv_general_dilated(
        x_nchw, w_oihw, window_strides=(1, 1), padding="SAME",
        dimension_numbers=("NCHW", "OIHW", "NCHW")) + bias.reshape(1, -1, 1, 1)
    pooled = lax.reduce_window(conv, -jnp.inf, lax.max,
                               window_dimensions=(1, 1, 2, 2),
                               window_strides=(1, 1, 2, 2),
                               padding="VALID")
    mean = jnp.mean(pooled, axis=(0, 2, 3), keepdims=True)
    var = jnp.mean((pooled - mean) ** 2, axis=(0, 2, 3), keepdims=True)
    y = ((pooled - mean) * lax.rsqrt(var + BN_EPS)
         * gamma.reshape(1, -1, 1, 1) + beta.reshape(1, -1, 1, 1))
    return _gelu_tanh(y)


if __name__ == "__main__":
    # Small, deterministic problem: N=2, Cin=4, Cout=8, spatial 16x16 (-> 8x8).
    N, Cin, Cout, H, W = 2, 4, 8, 16, 16
    key = jax.random.PRNGKey(0)
    kx, kw, kb = jax.random.split(key, 3)

    x = jax.random.normal(kx, (N, Cin, H, W), jnp.float32)
    # Synthetic Conv2d weight/bias; BatchNorm2d default init (gamma=1, beta=0).
    w = 0.1 * jax.random.normal(kw, (Cout, Cin, 3, 3), jnp.float32)
    b = 0.05 * jax.random.normal(kb, (Cout,), jnp.float32)
    gamma = jnp.ones((Cout,), jnp.float32)
    beta = jnp.zeros((Cout,), jnp.float32)

    out = jax.block_until_ready(encoder_block_forward(x, w, b, gamma, beta))
    ref = jax.block_until_ready(_reference_forward(x, w, b, gamma, beta))

    assert out.shape == (N, Cout, H // 2, W // 2), out.shape
    max_err = float(jnp.max(jnp.abs(out - ref)))
    assert jnp.allclose(out, ref, atol=1e-3, rtol=1e-3), max_err

    print("KERNEL_OK")
</pallas_src>

<mosaic_0001>
module attributes {stable_mosaic.version = 11 : i64} {
  func.func @encoder_block_kernel(%arg0: i32, %arg1: memref<1x36x128xf32, #tpu.memory_space<vmem>>, %arg2: memref<8x36xf32, #tpu.memory_space<vmem>>, %arg3: memref<8x1xf32, #tpu.memory_space<vmem>>, %arg4: memref<8x1xf32, #tpu.memory_space<vmem>>, %arg5: memref<8x1xf32, #tpu.memory_space<vmem>>, %arg6: memref<8x128xf32, #tpu.memory_space<vmem>>, %arg7: memref<8x128xf32, #tpu.memory_space<vmem>>) attributes {dimension_semantics = [#tpu.dimension_semantics<arbitrary>], iteration_bounds = array<i64: 4>, scalar_prefetch = 0 : i64, scratch_operands = 1 : i64, tpu.core_type = #tpu.core_type<tc>, window_params = [{transform_indices = @transform_0, window_bounds = array<i64: 1, 36, 128>}, {pipeline_mode = #tpu.pipeline_mode<synchronous>, transform_indices = @transform_1, window_bounds = array<i64: 8, 36>}, {pipeline_mode = #tpu.pipeline_mode<synchronous>, transform_indices = @transform_2, window_bounds = array<i64: 8, 1>}, {pipeline_mode = #tpu.pipeline_mode<synchronous>, transform_indices = @transform_3, window_bounds = array<i64: 8, 1>}, {pipeline_mode = #tpu.pipeline_mode<synchronous>, transform_indices = @transform_4, window_bounds = array<i64: 8, 1>}, {pipeline_mode = #tpu.pipeline_mode<synchronous>, transform_indices = @transform_5, window_bounds = array<i64: 8, 128>}]} {
    %c0 = arith.constant 0 : index
    %c0_0 = arith.constant 0 : index
    %0 = vector.load %arg2[%c0, %c0_0] : memref<8x36xf32, #tpu.memory_space<vmem>>, vector<8x36xf32>
    %c0_1 = arith.constant 0 : index
    %c0_2 = arith.constant 0 : index
    %c0_3 = arith.constant 0 : index
    %1 = vector.load %arg1[%c0_1, %c0_2, %c0_3] : memref<1x36x128xf32, #tpu.memory_space<vmem>>, vector<1x36x128xf32>
    %2 = vector.shape_cast %1 : vector<1x36x128xf32> to vector<36x128xf32>
    %cst = arith.constant dense<0.000000e+00> : vector<8x128xf32>
    %3 = tpu.matmul %0, %2, %cst {dimension_numbers = #tpu.dot_dimension_numbers<[1], [0], [0], [1], [0, 0, 1, 1], [], []>} : vector<8x36xf32>, vector<36x128xf32>, vector<8x128xf32> -> vector<8x128xf32>
    %c0_i32 = arith.constant 0 : i32
    %4 = arith.cmpi eq, %arg0, %c0_i32 : i32
    %5 = arith.extui %4 : i1 to i32
    %c0_i32_4 = arith.constant 0 : i32
    %6 = arith.cmpi ne, %5, %c0_i32_4 : i32
    scf.if %6 {
      %c0_8 = arith.constant 0 : index
      %c0_9 = arith.constant 0 : index
      %13 = vector.load %arg7[%c0_8, %c0_9] : memref<8x128xf32, #tpu.memory_space<vmem>>, vector<8x128xf32>
      tpu.vector_store %arg7[%c0_8, %c0_9], %3 {strides = array<i32>} : memref<8x128xf32, #tpu.memory_space<vmem>>, vector<8x128xf32>,
    } else {
    }
    %c0_i32_5 = arith.constant 0 : i32
    %7 = arith.cmpi sgt, %arg0, %c0_i32_5 : i32
    %8 = arith.extui %7 : i1 to i32
    %c0_i32_6 = arith.constant 0 : i32
    %9 = arith.cmpi ne, %8, %c0_i32_6 : i32
    scf.if %9 {
      %c0_8 = arith.constant 0 : index
      %c0_9 = arith.constant 0 : index
      %13 = vector.load %arg7[%c0_8, %c0_9] : memref<8x128xf32, #tpu.memory_space<vmem>>, vector<8x128xf32>
      %14 = arith.maximumf %13, %3 : vector<8x128xf32>
      %c0_10 = arith.constant 0 : index
      %c0_11 = arith.constant 0 : index
      %15 = vector.load %arg7[%c0_10, %c0_11] : memref<8x128xf32, #tpu.memory_space<vmem>>, vector<8x128xf32>
      tpu.vector_store %arg7[%c0_10, %c0_11], %14 {strides = array<i32>} : memref<8x128xf32, #tpu.memory_space<vmem>>, vector<8x128xf32>,
    } else {
    }
    %c3_i32 = arith.constant 3 : i32
    %10 = arith.cmpi eq, %arg0, %c3_i32 : i32
    %11 = arith.extui %10 : i1 to i32
    %c0_i32_7 = arith.constant 0 : i32
    %12 = arith.cmpi ne, %11, %c0_i32_7 : i32
    scf.if %12 {
      %c0_8 = arith.constant 0 : index
      %c0_9 = arith.constant 0 : index
      %13 = vector.load %arg7[%c0_8, %c0_9] : memref<8x128xf32, #tpu.memory_space<vmem>>, vector<8x128xf32>
      %c0_10 = arith.constant 0 : index
      %c0_11 = arith.constant 0 : index
      %14 = vector.load %arg3[%c0_10, %c0_11] : memref<8x1xf32, #tpu.memory_space<vmem>>, vector<8x1xf32>
      %15 = vector.broadcast %14 : vector<8x1xf32> to vector<8x128xf32>
      %16 = arith.addf %13, %15 : vector<8x128xf32>
      %cst_12 = arith.constant dense<0.000000e+00> : vector<8xf32>
      %17 = vector.multi_reduction <add>, %16, %cst_12 [1] : vector<8x128xf32> to vector<8xf32>
      %18 = vector.shape_cast %17 : vector<8xf32> to vector<8x1xf32>
      %cst_13 = arith.constant 7.812500e-03 : f32
      %19 = vector.broadcast %cst_13 : f32 to vector<8x1xf32>
      %20 = arith.mulf %18, %19 : vector<8x1xf32>
      %21 = arith.mulf %16, %16 : vector<8x128xf32>
      %cst_14 = arith.constant dense<0.000000e+00> : vector<8xf32>
      %22 = vector.multi_reduction <add>, %21, %cst_14 [1] : vector<8x128xf32> to vector<8xf32>
      %23 = vector.shape_cast %22 : vector<8xf32> to vector<8x1xf32>
      %cst_15 = arith.constant 7.812500e-03 : f32
      %24 = vector.broadcast %cst_15 : f32 to vector<8x1xf32>
      %25 = arith.mulf %23, %24 : vector<8x1xf32>
      %26 = arith.mulf %20, %20 : vector<8x1xf32>
      %27 = arith.subf %25, %26 : vector<8x1xf32>
      %cst_16 = arith.constant 9.99999974E-6 : f32
      %28 = vector.broadcast %cst_16 : f32 to vector<8x1xf32>
      %29 = arith.addf %27, %28 : vector<8x1xf32>
      %30 = math.rsqrt %29 : vector<8x1xf32>
      %c0_17 = arith.constant 0 : index
      %c0_18 = arith.constant 0 : index
      %31 = vector.load %arg4[%c0_17, %c0_18] : memref<8x1xf32, #tpu.memory_space<vmem>>, vector<8x1xf32>
      %32 = arith.mulf %31, %30 : vector<8x1xf32>
      %c0_19 = arith.constant 0 : index
      %c0_20 = arith.constant 0 : index
      %33 = vector.load %arg5[%c0_19, %c0_20] : memref<8x1xf32, #tpu.memory_space<vmem>>, vector<8x1xf32>
      %34 = arith.mulf %20, %32 : vector<8x1xf32>
      %35 = arith.subf %33, %34 : vector<8x1xf32>
      %36 = vector.broadcast %32 : vector<8x1xf32> to vector<8x128xf32>
      %37 = arith.mulf %16, %36 : vector<8x128xf32>
      %38 = vector.broadcast %35 : vector<8x1xf32> to vector<8x128xf32>
      %39 = arith.addf %37, %38 : vector<8x128xf32>
      %cst_21 = arith.constant 5.000000e-01 : f32
      %40 = vector.broadcast %cst_21 : f32 to vector<8x128xf32>
      %41 = arith.mulf %40, %39 : vector<8x128xf32>
      %42 = arith.mulf %39, %39 : vector<8x128xf32>
      %43 = arith.mulf %42, %39 : vector<8x128xf32>
      %cst_22 = arith.constant 4.471500e-02 : f32
      %44 = vector.broadcast %cst_22 : f32 to vector<8x128xf32>
      %45 = arith.mulf %44, %43 : vector<8x128xf32>
      %46 = arith.addf %39, %45 : vector<8x128xf32>
      %cst_23 = arith.constant 0.797884583 : f32
      %47 = vector.broadcast %cst_23 : f32 to vector<8x128xf32>
      %48 = arith.mulf %47, %46 : vector<8x128xf32>
      %49 = math.tanh %48 : vector<8x128xf32>
      %cst_24 = arith.constant 1.000000e+00 : f32
      %50 = vector.broadcast %cst_24 : f32 to vector<8x128xf32>
      %51 = arith.addf %50, %49 : vector<8x128xf32>
      %52 = arith.mulf %41, %51 : vector<8x128xf32>
      %c0_25 = arith.constant 0 : index
      %c0_26 = arith.constant 0 : index
      %53 = vector.load %arg6[%c0_25, %c0_26] : memref<8x128xf32, #tpu.memory_space<vmem>>, vector<8x128xf32>
      tpu.vector_store %arg6[%c0_25, %c0_26], %52 {strides = array<i32>} : memref<8x128xf32, #tpu.memory_space<vmem>>, vector<8x128xf32>,
    } else {
    }
    return
  }
  func.func @transform_0(%arg0: i32) -> (i32, i32, i32) {
    %c0_i32 = arith.constant 0 : i32
    %c0_i32_0 = arith.constant 0 : i32
    %c0_i32_1 = arith.constant 0 : i32
    return %arg0, %c0_i32, %c0_i32_0 : i32, i32, i32
  }
  func.func @transform_1(%arg0: i32) -> (i32, i32) {
    %c0_i32 = arith.constant 0 : i32
    %c0_i32_0 = arith.constant 0 : i32
    %c0_i32_1 = arith.constant 0 : i32
    return %c0_i32, %c0_i32_0 : i32, i32
  }
  func.func @transform_2(%arg0: i32) -> (i32, i32) {
    %c0_i32 = arith.constant 0 : i32
    %c0_i32_0 = arith.constant 0 : i32
    %c0_i32_1 = arith.constant 0 : i32
    return %c0_i32, %c0_i32_0 : i32, i32
  }
  func.func @transform_3(%arg0: i32) -> (i32, i32) {
    %c0_i32 = arith.constant 0 : i32
    %c0_i32_0 = arith.constant 0 : i32
    %c0_i32_1 = arith.constant 0 : i32
    return %c0_i32, %c0_i32_0 : i32, i32
  }
  func.func @transform_4(%arg0: i32) -> (i32, i32) {
    %c0_i32 = arith.constant 0 : i32
    %c0_i32_0 = arith.constant 0 : i32
    %c0_i32_1 = arith.constant 0 : i32
    return %c0_i32, %c0_i32_0 : i32, i32
  }
  func.func @transform_5(%arg0: i32) -> (i32, i32) {
    %c0_i32 = arith.constant 0 : i32
    %c0_i32_0 = arith.constant 0 : i32
    %c0_i32_1 = arith.constant 0 : i32
    return %c0_i32, %c0_i32_0 : i32, i32
  }
}

</mosaic_0001>

<bundles_post_ra>
// kernel: tpu_custom_call.1
= control target key start
LH: loop header
LB: loop body
LE: loop exit
PB: predicated region body
PF: predicated region fallthrough
CT: control target
= control target key end

     0   :  { %10 = vsyncpa [#allocation4], 0  ;;  %s474_s18 = smov 0   ;;  %s511_s0 = inlined_call_operand.vmem [shape: f32[4,36,128], index: 0, kind: input, shape index: {}]   ;;  %s512_s1 = inlined_call_operand.vmem [shape: f32[8,36], index: 1, kind: input, shape index: {}]   ;;  %s513_s2 = inlined_call_operand.vmem [shape: f32[8,1], index: 2, kind: input, shape index: {}]   ;;  %s514_s3 = inlined_call_operand.vmem [shape: f32[8,1], index: 3, kind: input, shape index: {}]   ;;  %s515_s4 = inlined_call_operand.vmem [shape: f32[8,1], index: 4, kind: input, shape index: {}]   ;;  %s516_s5 = inlined_call_operand.hbm [shape: f32[8,128], index: 5, kind: output, shape index: {}]  }
   0x1 LB: > { %s480_s19 = sadd.s32 4294967295, %s440_s18   ;;  %p367_p0 = scmp.ge.s32.totalorder %s440_s18, 1  ;;  %s440_s18 = sphi %s474_s18, %s16_s18  }
   0x2   : > { %p183_p1 = scmp.lt.s32.totalorder %s440_s18, 5 }
   0x4   : > { %p184_p2 = pnand %p367_p0, %p183_p1 }
   0x5   : > { %p206_p3 = scmp.lt.s32.totalorder (!%p184_p2), %s480_s19, 3  ;;  %p371_p4 = scmp.ne.s32.totalorder (!%p184_p2), %s480_s19, 0 }
   0x6   : > { %187 = sbr.rel (%p184_p2) target bundleno = 580 (0x244), region = 40 }
   0xb   : > { %s207_s20 = scalar_select %p206_p3, %s480_s19, 3  ;;  %vm221_vm0 = vcmask 1043456   ;;  %v211_v5 = vld [vmem:[%s512_s1] sm:$0xff]  ;;  %vm217_vm1 = vcmask 293888  }
   0xd   : > { %s378_s21 = smul.u32 40, %s207_s20 }
   0xf   : > { %s210_s24 = scalar_lea.vmem %s511_s0, %s378_s21 }
  0x10   : > { %v216_v0 = vld [vmem:[%s210_s24 + $0x20] sm:$0xf]  ;;  %v215_v1 = vld [vmem:[%s210_s24 + $0x18] sm:$0xff]  ;;  %v214_v2 = vld [vmem:[%s210_s24 + $0x10] sm:$0xff] }
  0x11   : > { %369 = vmatpush.msk.msra.mxu0 %vm221_vm0, %v216_v0  ;;  %v213_v3 = vld [vmem:[%s210_s24 + $0x8] sm:$0xff]  ;;  %v212_v4 = vld [vmem:[%s210_s24] sm:$0xff] }
  0x13   : > { %237 = vmatpush.msra.mxu0 %v215_v1 }
  0x15   : > { %238 = vmatpush.msra.mxu0 %v214_v2 }
  0x17   : > { %239 = vmatpush.msra.mxu0 %v213_v3 }
  0x19   : > { %240 = vmatpush.msra.mxu0 %v212_v4 }
  0x1a   : > { %370 = vmatmul.msk.f32.vlgmr.msra.gmra.mxu0 %vm217_vm1, %v211_v5 }
  0x93   : > { %248 = sbr.rel (%p371_p4) target bundleno = 153 (0x99), region = 44 }
  0x97   : > { %v242_v6 = vpop.f32.mrf.mxu0 }
  0x98   : > { %249 = vst [vmem:[#allocation2] sm:$0xff] %v242_v6 }
  0x99 PF: > { %p372_p5 = scmp.le.s32.totalorder %s480_s19, 0 }
  0x9b   : > { %253 = sbr.rel (%p372_p5) target bundleno = 164 (0xa4), region = 48 }
  0xa0   : > { %v254_v7 = vld [vmem:[#allocation2] sm:$0xff] }
  0xa1   : > { %v255_v8 = vmax.f32 %v254_v7, %v242_v6 }
  0xa3   : > { %256 = vst [vmem:[#allocation2] sm:$0xff] %v255_v8 }
  0xa4 PF: > { %p373_p6 = scmp.ne.s32.totalorder %s480_s19, 3 }
  0xa6   : > { %260 = sbr.rel (%p373_p6) target bundleno = 575 (0x23f), region = 52 }
  0xab   : > { %v262_v9 = vld [vmem:[%s513_s2] sm:$0xff]  ;;  %v442_v10 = vmov 0  }
  0xac   : > { %395 = vset.pattern.permute.xlu0 %v442_v10  ;;  %396 = vset.pattern.permute.xlu1 %v442_v10  ;;  %v261_v11 = vld [vmem:[#allocation2] sm:$0xff] }
  0xad   : > { %265 = vperm.xlu0 %395, %v262_v9   ;;  %397 = vset.pattern.permute.xlu2 %v442_v10  ;;  %v289_v28 = vld [vmem:[%s514_s3] sm:$0xff] }
  0xae   : > { %v291_v31 = vld [vmem:[%s515_s4] sm:$0xff] }
 0x11f   : > { %v266_v12 = vpop.permute.xlu0 %265 }
 0x120   : > { %v268_v13 = vadd.f32 %v266_v12, %v261_v11 }
 0x122   : > { %269 = vadd.xlane.f32.xlu0 %v268_v13  ;;  %v272_v14 = vmul.f32 %v268_v13, %v268_v13 }
 0x124   : > { %273 = vadd.xlane.f32.xlu1 %v272_v14 }
 0x195   : > { %v270_v15 = vpop.xlane.xlu0 %269 }
 0x196   : > { %v271_v16 = vmul.f32 0.0078125, %v270_v15 }
 0x197   : > { %v274_v17 = vpop.xlane.xlu1 %273 }
 0x198   : > { %v276_v18 = vmul.f32 %v271_v16, %v271_v16  ;;  %v275_v19 = vmul.f32 0.0078125, %v274_v17 }
 0x19a   : > { %v277_v20 = vsub.f32 %v275_v19, %v276_v18 }
 0x19c   : > { %v278_v21 = vadd.f32 1e-05, %v277_v20 }
 0x19e   : > { %398 = vrsqrt.f32 %v278_v21  ;;  %vm285_vm3 = vweird.f32 %v278_v21 }
 0x1a4   : > { %v399_v22 = vpop.eup %398 }
 0x1a5   : > { %v280_v23 = vmul.f32 %v399_v22, %v278_v21  ;;  %vm286_vm2 = vweird.f32 %v399_v22 }
 0x1a6   : > { %vm287_vm4 = vmor %vm285_vm3, %vm286_vm2 }
 0x1a7   : > { %v281_v24 = vmul.f32 %v399_v22, %v280_v23 }
 0x1a9   : > { %v282_v25 = vmul.f32 0.5, %v281_v24 }
 0x1ab   : > { %v283_v26 = vsub.f32 1.5, %v282_v25 }
 0x1ad   : > { %v284_v27 = vmul.f32 %v399_v22, %v283_v26 }
 0x1af   : > { %v288_v29 = vsel %vm287_vm4, %v399_v22, %v284_v27 }
 0x1b0   : > { %v290_v30 = vmul.f32 %v289_v28, %v288_v29 }
 0x1b2   : > { %296 = vperm.xlu1 %396, %v290_v30   ;;  %v292_v32 = vmul.f32 %v290_v30, %v271_v16 }
 0x1b4   : > { %v293_v33 = vsub.f32 %v291_v31, %v292_v32 }
 0x1b6   : > { %302 = vperm.xlu2 %397, %v293_v33  }
 0x210   : > { %v303_v36 = vpop.permute.xlu2 %302 }
 0x224   : > { %v297_v34 = vpop.permute.xlu1 %296 }
 0x225   : > { %v299_v35 = vmul.f32 %v297_v34, %v268_v13 }
 0x227   : > { %v305_v37 = vadd.f32 %v303_v36, %v299_v35 }
 0x229   : > { %v307_v38 = vmul.f32 %v305_v37, %v305_v37  ;;  %v306_v44 = vmul.f32 0.5, %v305_v37 }
 0x22b   : > { %v308_v39 = vmul.f32 %v307_v38, %v305_v37 }
 0x22d   : > { %v309_v40 = vmul.f32 0.044715, %v308_v39 }
 0x22f   : > { %v310_v41 = vadd.f32 %v309_v40, %v305_v37 }
 0x231   : > { %v311_v42 = vmul.f32 0.7978846, %v310_v41 }
 0x233   : > { %400 = vtanh.f32 %v311_v42 }
 0x239   : > { %v401_v43 = vpop.eup %400 }
 0x23a   : > { %v313_v45 = vadd.f32 1.0, %v401_v43 }
 0x23c   : > { %v314_v46 = vmul.f32 %v313_v45, %v306_v44 }
 0x23e   : > { %315 = vst [vmem:[#allocation3] sm:$0xff] %v314_v46 }
 0x23f PF: > { %p383_p7 = scmp.eq.s32.totalorder %s480_s19, 3  ;;  %s443_s8 = smov [#allocation3]  }
 0x240   : > { %s322_s9 = sshll.u32 %s443_s8, 4  ;;  %s324_s12 = sshll.u32 %s516_s5, 4  ;;  %s323_s9 = int_to_ptr.vmem [resolvable:$true] %s322_s9  ;;  %s325_s12 = int_to_ptr.hbm [resolvable:$true] %s324_s12 }
 0x241   : > { %380 = dma.vmem_to_hbm [thread:$0]  (%p383_p7), %s323_s9, 128, %s325_s12, [#allocation4]  }
 0x242   : > { %435 = dma.done.wait (%p383_p7), [#allocation4], 128  }
 0x243   : > { %437 = vsyncadd (%p383_p7), [#allocation4], 4294967168 }
 0x244 PF: > { %s16_s18 = sadd.s32 1, %s440_s18  }
 0x245   : > { %p13_p8 = scmp.ge.s32.totalorder %s16_s18, 6  }
 0x247   :  { %15 = sbr.rel (!%p13_p8) target bundleno = 1 (0x1), region = 79 }
 0x24c   :  { %338 = vsyncpa [#allocation4], 1 }
 0x24d   :  { %340 = vsyncpa [#allocation4 + $0x1], 1 }

</bundles_post_ra>
